<compile_context>
chip_gen: v7x
topology: tpu7x:2x2x1
jax: 0.10.0
libtpu: 0.0.40
codegen_flags: <defaults>
</compile_context>

<pallas_src>
import numpy as np

import jax
import jax.numpy as jnp
from jax import lax
from jax.experimental import pallas as pl
from jax.experimental.pallas import tpu as pltpu


def fold_bn(gamma, beta, mean, var, eps=1e-5):
    """Eval-mode BatchNorm -> per-channel (scale, bias)."""
    scale = gamma / jnp.sqrt(var + eps)
    bias = beta - mean * scale
    return scale, bias


def make_inverted_residual(N, Cin, Cout, H, W, K, STRIDE, PAD, EXPANSION):
    """Returns forward(x_nchw, w1, bn1, wd, bn2, w3, bn3) for the block."""
    Cexp = EXPANSION * Cin
    Hout = (H + 2 * PAD - K) // STRIDE + 1
    Wout = (W + 2 * PAD - K) // STRIDE + 1
    RESIDUAL = (STRIDE == 1) and (Cin == Cout)
    # Kernel computes the stride-1 result on the input grid; wrapper subsamples
    # for stride > 1.  Requires the MNASNet convention pad <= (K-1)/2.
    assert 2 * PAD <= K - 1, "expected padding <= (kernel_size - 1) // 2"

    HWi = H * W
    M = N * HWi
    # Images per grid step: largest divisor of N that is <= 8.
    NB = max(d for d in range(1, min(N, 8) + 1) if N % d == 0)
    MB = NB * HWi
    GRID = N // NB

    # Static per-tap border-validity mask over one image plane, tiled over the
    # NB images of a block.  mask[t, q] == 1 iff tap t of output position q
    # reads inside the same image (zero padding / cross-image reads -> 0).
    mask = np.zeros((K * K, HWi), np.float32)
    for t in range(K * K):
        dy, dx = t // K, t % K
        for i in range(H):
            for j in range(W):
                ii, jj = i + dy - PAD, j + dx - PAD
                if 0 <= ii < H and 0 <= jj < W:
                    mask[t, i * W + j] = 1.0
    mask_nb = jnp.asarray(np.tile(mask, (1, NB)))            # (K*K, MB)

    def kernel(x_ref, w1_ref, b1_ref, wm_ref, b2_ref, w3_ref, b3_ref, o_ref):
        x = x_ref[...]                                        # (Cin, MB)

        # ---- 1x1 expansion (BN1 scale folded into weights) + bias + ReLU6 ---
        y = jnp.dot(w1_ref[...], x, preferred_element_type=jnp.float32)
        y = jnp.clip(y + b1_ref[...], 0.0, 6.0)               # (Cexp, MB)

        # ---- KxK depthwise conv via XLU lane rolls + masked weights ---------
        # Positions whose roll wraps (image/block border) are exactly the
        # zero-padding positions and are zeroed by the precombined mask.
        acc = jnp.zeros((Cexp, MB), jnp.float32)
        for t in range(K * K):                                # static -> unrolled
            dy, dx = t // K, t % K
            shift = (dy - PAD) * W + (dx - PAD)
            src = pltpu.roll(y, (-shift) % MB, axis=1) if shift % MB else y
            acc = acc + wm_ref[t] * src
        h = jnp.clip(acc + b2_ref[...], 0.0, 6.0)             # (Cexp, MB)

        # ---- 1x1 projection (BN3 scale folded) + bias (+ residual) ----------
        z = jnp.dot(w3_ref[...], h, preferred_element_type=jnp.float32)
        z = z + b3_ref[...]                                   # (Cout, MB)
        if RESIDUAL:
            z = z + x
        o_ref[...] = z.astype(o_ref.dtype)                    # lane-dense store

    grid_spec = pltpu.PrefetchScalarGridSpec(
        num_scalar_prefetch=0,
        grid=(GRID,),
        in_specs=[
            pl.BlockSpec((Cin, MB), lambda g: (0, g)),            # x, spatial-major
            pl.BlockSpec((Cexp, Cin), lambda g: (0, 0)),          # folded expand W
            pl.BlockSpec((Cexp, 1), lambda g: (0, 0)),            # bias 1
            pl.BlockSpec((K * K, Cexp, MB), lambda g: (0, 0, 0)),  # dw weight*mask
            pl.BlockSpec((Cexp, 1), lambda g: (0, 0)),            # bias 2
            pl.BlockSpec((Cout, Cexp), lambda g: (0, 0)),         # folded project W
            pl.BlockSpec((Cout, 1), lambda g: (0, 0)),            # bias 3
        ],
        out_specs=pl.BlockSpec((Cout, MB), lambda g: (0, g)),     # last dim % 128 == 0
    )

    pallas_fn = pl.pallas_call(
        kernel,
        out_shape=jax.ShapeDtypeStruct((Cout, M), jnp.float32),
        grid_spec=grid_spec,
        compiler_params=pltpu.CompilerParams(
            dimension_semantics=("parallel",)),
    )

    @jax.jit
    def forward(x_nchw, w1, bn1, wd, bn2, w3, bn3):
        # One-time constant transforms (would live in module init in practice).
        s1, b1 = fold_bn(*bn1)
        s2, b2 = fold_bn(*bn2)
        s3, b3 = fold_bn(*bn3)
        w1f = w1[:, :, 0, 0] * s1[:, None]                        # (Cexp, Cin)
        w3f = w3[:, :, 0, 0] * s3[:, None]                        # (Cout, Cexp)
        wdf = wd[:, 0, :, :].reshape(Cexp, K * K) * s2[:, None]   # (Cexp, K*K)
        wm = wdf.T[:, :, None] * mask_nb[:, None, :]              # (K*K, Cexp, MB)

        # Layout plumbing: NCHW -> (Cin, N*H*W) with spatial*batch in lanes.
        xT = jnp.transpose(x_nchw, (1, 0, 2, 3)).reshape(Cin, M)

        out_flat = pallas_fn(xT, w1f, b1[:, None], wm, b2[:, None],
                             w3f, b3[:, None])                    # (Cout, N*H*W)

        # Back to NCHW; subsample for stride / crop to (Hout, Wout).
        full = jnp.transpose(out_flat.reshape(Cout, N, H, W), (1, 0, 2, 3))
        return full[:, :,
                    0:(Hout - 1) * STRIDE + 1:STRIDE,
                    0:(Wout - 1) * STRIDE + 1:STRIDE]

    return forward, Hout, Wout, Cexp, RESIDUAL


def reference_nchw(x, w1, bn1, wd, bn2, w3, bn3, stride, pad, groups, residual,
                   eps=1e-5):
    """Pure-JAX mirror of the PyTorch module (eval-mode BatchNorm)."""
    def bn(v, p):
        g, b, m, var = p
        inv = g / jnp.sqrt(var + eps)
        return v * inv[None, :, None, None] + (b - m * inv)[None, :, None, None]

    dn = ('NCHW', 'OIHW', 'NCHW')
    out = lax.conv_general_dilated(x, w1, (1, 1), 'VALID', dimension_numbers=dn)
    out = jnp.clip(bn(out, bn1), 0.0, 6.0)
    out = lax.conv_general_dilated(out, wd, (stride, stride),
                                   [(pad, pad), (pad, pad)],
                                   dimension_numbers=dn,
                                   feature_group_count=groups)
    out = jnp.clip(bn(out, bn2), 0.0, 6.0)
    out = lax.conv_general_dilated(out, w3, (1, 1), 'VALID', dimension_numbers=dn)
    out = bn(out, bn3)
    if residual:
        out = out + x
    return out


if __name__ == "__main__":
    # Module hyper-parameters (small, residual path active).
    N, Cin, H, W = 2, 4, 16, 16
    Cout, K, STRIDE, PAD, EXPANSION = 4, 3, 1, 1, 3
    Cexp = EXPANSION * Cin

    forward, Hout, Wout, _, RESIDUAL = make_inverted_residual(
        N, Cin, Cout, H, W, K, STRIDE, PAD, EXPANSION)

    key = jax.random.PRNGKey(0)
    ks = jax.random.split(key, 8)

    # Input and weights in PyTorch layouts (NCHW / OIHW).
    x = jax.random.normal(ks[0], (N, Cin, H, W), jnp.float32)
    w1 = jax.random.normal(ks[1], (Cexp, Cin, 1, 1), jnp.float32) * 0.2
    wd = jax.random.normal(ks[2], (Cexp, 1, K, K), jnp.float32) * 0.2
    w3 = jax.random.normal(ks[3], (Cout, Cexp, 1, 1), jnp.float32) * 0.2

    def bn_params(k, C):
        k1, k2, k3, k4 = jax.random.split(k, 4)
        gamma = jax.random.uniform(k1, (C,), jnp.float32, 0.5, 1.5)
        beta = jax.random.normal(k2, (C,), jnp.float32) * 0.1
        mean = jax.random.normal(k3, (C,), jnp.float32) * 0.1
        var = jax.random.uniform(k4, (C,), jnp.float32, 0.5, 1.5)
        return gamma, beta, mean, var

    bn1 = bn_params(ks[4], Cexp)
    bn2 = bn_params(ks[5], Cexp)
    bn3 = bn_params(ks[6], Cout)

    out = forward(x, w1, bn1, wd, bn2, w3, bn3)
    out = jax.block_until_ready(out)

    ref = reference_nchw(x, w1, bn1, wd, bn2, w3, bn3,
                         STRIDE, PAD, Cexp, RESIDUAL)
    assert out.shape == (N, Cout, Hout, Wout), out.shape
    max_err = float(jnp.max(jnp.abs(out - ref)))
    assert jnp.allclose(out, ref, atol=2e-4, rtol=2e-4), max_err

    print("KERNEL_OK")
</pallas_src>

<mosaic_0001>
module attributes {stable_mosaic.version = 11 : i64} {
  func.func @kernel(%arg0: i32, %arg1: memref<4x512xf32, #tpu.memory_space<vmem>>, %arg2: memref<12x4xf32, #tpu.memory_space<vmem>>, %arg3: memref<12x1xf32, #tpu.memory_space<vmem>>, %arg4: memref<9x12x512xf32, #tpu.memory_space<vmem>>, %arg5: memref<12x1xf32, #tpu.memory_space<vmem>>, %arg6: memref<4x12xf32, #tpu.memory_space<vmem>>, %arg7: memref<4x1xf32, #tpu.memory_space<vmem>>, %arg8: memref<4x512xf32, #tpu.memory_space<vmem>>) attributes {dimension_semantics = [#tpu.dimension_semantics<parallel>], iteration_bounds = array<i64: 1>, scalar_prefetch = 0 : i64, scratch_operands = 0 : i64, tpu.core_type = #tpu.core_type<tc>, window_params = [{transform_indices = @transform_0, window_bounds = array<i64: 4, 512>}, {pipeline_mode = #tpu.pipeline_mode<synchronous>, transform_indices = @transform_1, window_bounds = array<i64: 12, 4>}, {pipeline_mode = #tpu.pipeline_mode<synchronous>, transform_indices = @transform_2, window_bounds = array<i64: 12, 1>}, {pipeline_mode = #tpu.pipeline_mode<synchronous>, transform_indices = @transform_3, window_bounds = array<i64: 9, 12, 512>}, {pipeline_mode = #tpu.pipeline_mode<synchronous>, transform_indices = @transform_4, window_bounds = array<i64: 12, 1>}, {pipeline_mode = #tpu.pipeline_mode<synchronous>, transform_indices = @transform_5, window_bounds = array<i64: 4, 12>}, {pipeline_mode = #tpu.pipeline_mode<synchronous>, transform_indices = @transform_6, window_bounds = array<i64: 4, 1>}, {transform_indices = @transform_7, window_bounds = array<i64: 4, 512>}]} {
    %c0 = arith.constant 0 : index
    %c0_0 = arith.constant 0 : index
    %0 = vector.load %arg1[%c0, %c0_0] : memref<4x512xf32, #tpu.memory_space<vmem>>, vector<4x512xf32>
    %c0_1 = arith.constant 0 : index
    %c0_2 = arith.constant 0 : index
    %1 = vector.load %arg2[%c0_1, %c0_2] : memref<12x4xf32, #tpu.memory_space<vmem>>, vector<12x4xf32>
    %cst = arith.constant dense<0.000000e+00> : vector<12x512xf32>
    %2 = tpu.matmul %1, %0, %cst {dimension_numbers = #tpu.dot_dimension_numbers<[1], [0], [0], [1], [0, 0, 1, 1], [], []>} : vector<12x4xf32>, vector<4x512xf32>, vector<12x512xf32> -> vector<12x512xf32>
    %c0_3 = arith.constant 0 : index
    %c0_4 = arith.constant 0 : index
    %3 = vector.load %arg3[%c0_3, %c0_4] : memref<12x1xf32, #tpu.memory_space<vmem>>, vector<12x1xf32>
    %4 = vector.broadcast %3 : vector<12x1xf32> to vector<12x512xf32>
    %5 = arith.addf %2, %4 : vector<12x512xf32>
    %cst_5 = arith.constant 0.000000e+00 : f32
    %cst_6 = arith.constant 6.000000e+00 : f32
    %6 = vector.broadcast %cst_5 : f32 to vector<12x512xf32>
    %7 = arith.maximumf %6, %5 : vector<12x512xf32>
    %8 = vector.broadcast %cst_6 : f32 to vector<12x512xf32>
    %9 = arith.minimumf %8, %7 : vector<12x512xf32>
    %cst_7 = arith.constant 0.000000e+00 : f32
    %10 = vector.broadcast %cst_7 : f32 to vector<12x512xf32>
    %c17_i32 = arith.constant 17 : i32
    %11 = tpu.dynamic_rotate %9 by %c17_i32 dim 1 : vector<12x512xf32>, i32 -> vector<12x512xf32>
    %c0_8 = arith.constant 0 : index
    %c0_9 = arith.constant 0 : index
    %c0_10 = arith.constant 0 : index
    %12 = vector.load %arg4[%c0_8, %c0_9, %c0_10] : memref<9x12x512xf32, #tpu.memory_space<vmem>>, vector<1x12x512xf32>
    %13 = vector.shape_cast %12 : vector<1x12x512xf32> to vector<12x512xf32>
    %14 = arith.mulf %13, %11 : vector<12x512xf32>
    %15 = arith.addf %10, %14 : vector<12x512xf32>
    %c16_i32 = arith.constant 16 : i32
    %16 = tpu.dynamic_rotate %9 by %c16_i32 dim 1 : vector<12x512xf32>, i32 -> vector<12x512xf32>
    %c1 = arith.constant 1 : index
    %c0_11 = arith.constant 0 : index
    %c0_12 = arith.constant 0 : index
    %17 = vector.load %arg4[%c1, %c0_11, %c0_12] : memref<9x12x512xf32, #tpu.memory_space<vmem>>, vector<1x12x512xf32>
    %18 = vector.shape_cast %17 : vector<1x12x512xf32> to vector<12x512xf32>
    %19 = arith.mulf %18, %16 : vector<12x512xf32>
    %20 = arith.addf %15, %19 : vector<12x512xf32>
    %c15_i32 = arith.constant 15 : i32
    %21 = tpu.dynamic_rotate %9 by %c15_i32 dim 1 : vector<12x512xf32>, i32 -> vector<12x512xf32>
    %c2 = arith.constant 2 : index
    %c0_13 = arith.constant 0 : index
    %c0_14 = arith.constant 0 : index
    %22 = vector.load %arg4[%c2, %c0_13, %c0_14] : memref<9x12x512xf32, #tpu.memory_space<vmem>>, vector<1x12x512xf32>
    %23 = vector.shape_cast %22 : vector<1x12x512xf32> to vector<12x512xf32>
    %24 = arith.mulf %23, %21 : vector<12x512xf32>
    %25 = arith.addf %20, %24 : vector<12x512xf32>
    %c1_i32 = arith.constant 1 : i32
    %26 = tpu.dynamic_rotate %9 by %c1_i32 dim 1 : vector<12x512xf32>, i32 -> vector<12x512xf32>
    %c3 = arith.constant 3 : index
    %c0_15 = arith.constant 0 : index
    %c0_16 = arith.constant 0 : index
    %27 = vector.load %arg4[%c3, %c0_15, %c0_16] : memref<9x12x512xf32, #tpu.memory_space<vmem>>, vector<1x12x512xf32>
    %28 = vector.shape_cast %27 : vector<1x12x512xf32> to vector<12x512xf32>
    %29 = arith.mulf %28, %26 : vector<12x512xf32>
    %30 = arith.addf %25, %29 : vector<12x512xf32>
    %c4 = arith.constant 4 : index
    %c0_17 = arith.constant 0 : index
    %c0_18 = arith.constant 0 : index
    %31 = vector.load %arg4[%c4, %c0_17, %c0_18] : memref<9x12x512xf32, #tpu.memory_space<vmem>>, vector<1x12x512xf32>
    %32 = vector.shape_cast %31 : vector<1x12x512xf32> to vector<12x512xf32>
    %33 = arith.mulf %32, %9 : vector<12x512xf32>
    %34 = arith.addf %30, %33 : vector<12x512xf32>
    %c511_i32 = arith.constant 511 : i32
    %35 = tpu.dynamic_rotate %9 by %c511_i32 dim 1 : vector<12x512xf32>, i32 -> vector<12x512xf32>
    %c5 = arith.constant 5 : index
    %c0_19 = arith.constant 0 : index
    %c0_20 = arith.constant 0 : index
    %36 = vector.load %arg4[%c5, %c0_19, %c0_20] : memref<9x12x512xf32, #tpu.memory_space<vmem>>, vector<1x12x512xf32>
    %37 = vector.shape_cast %36 : vector<1x12x512xf32> to vector<12x512xf32>
    %38 = arith.mulf %37, %35 : vector<12x512xf32>
    %39 = arith.addf %34, %38 : vector<12x512xf32>
    %c497_i32 = arith.constant 497 : i32
    %40 = tpu.dynamic_rotate %9 by %c497_i32 dim 1 : vector<12x512xf32>, i32 -> vector<12x512xf32>
    %c6 = arith.constant 6 : index
    %c0_21 = arith.constant 0 : index
    %c0_22 = arith.constant 0 : index
    %41 = vector.load %arg4[%c6, %c0_21, %c0_22] : memref<9x12x512xf32, #tpu.memory_space<vmem>>, vector<1x12x512xf32>
    %42 = vector.shape_cast %41 : vector<1x12x512xf32> to vector<12x512xf32>
    %43 = arith.mulf %42, %40 : vector<12x512xf32>
    %44 = arith.addf %39, %43 : vector<12x512xf32>
    %c496_i32 = arith.constant 496 : i32
    %45 = tpu.dynamic_rotate %9 by %c496_i32 dim 1 : vector<12x512xf32>, i32 -> vector<12x512xf32>
    %c7 = arith.constant 7 : index
    %c0_23 = arith.constant 0 : index
    %c0_24 = arith.constant 0 : index
    %46 = vector.load %arg4[%c7, %c0_23, %c0_24] : memref<9x12x512xf32, #tpu.memory_space<vmem>>, vector<1x12x512xf32>
    %47 = vector.shape_cast %46 : vector<1x12x512xf32> to vector<12x512xf32>
    %48 = arith.mulf %47, %45 : vector<12x512xf32>
    %49 = arith.addf %44, %48 : vector<12x512xf32>
    %c495_i32 = arith.constant 495 : i32
    %50 = tpu.dynamic_rotate %9 by %c495_i32 dim 1 : vector<12x512xf32>, i32 -> vector<12x512xf32>
    %c8 = arith.constant 8 : index
    %c0_25 = arith.constant 0 : index
    %c0_26 = arith.constant 0 : index
    %51 = vector.load %arg4[%c8, %c0_25, %c0_26] : memref<9x12x512xf32, #tpu.memory_space<vmem>>, vector<1x12x512xf32>
    %52 = vector.shape_cast %51 : vector<1x12x512xf32> to vector<12x512xf32>
    %53 = arith.mulf %52, %50 : vector<12x512xf32>
    %54 = arith.addf %49, %53 : vector<12x512xf32>
    %c0_27 = arith.constant 0 : index
    %c0_28 = arith.constant 0 : index
    %55 = vector.load %arg5[%c0_27, %c0_28] : memref<12x1xf32, #tpu.memory_space<vmem>>, vector<12x1xf32>
    %56 = vector.broadcast %55 : vector<12x1xf32> to vector<12x512xf32>
    %57 = arith.addf %54, %56 : vector<12x512xf32>
    %cst_29 = arith.constant 0.000000e+00 : f32
    %cst_30 = arith.constant 6.000000e+00 : f32
    %58 = vector.broadcast %cst_29 : f32 to vector<12x512xf32>
    %59 = arith.maximumf %58, %57 : vector<12x512xf32>
    %60 = vector.broadcast %cst_30 : f32 to vector<12x512xf32>
    %61 = arith.minimumf %60, %59 : vector<12x512xf32>
    %c0_31 = arith.constant 0 : index
    %c0_32 = arith.constant 0 : index
    %62 = vector.load %arg6[%c0_31, %c0_32] : memref<4x12xf32, #tpu.memory_space<vmem>>, vector<4x12xf32>
    %cst_33 = arith.constant dense<0.000000e+00> : vector<4x512xf32>
    %63 = tpu.matmul %62, %61, %cst_33 {dimension_numbers = #tpu.dot_dimension_numbers<[1], [0], [0], [1], [0, 0, 1, 1], [], []>} : vector<4x12xf32>, vector<12x512xf32>, vector<4x512xf32> -> vector<4x512xf32>
    %c0_34 = arith.constant 0 : index
    %c0_35 = arith.constant 0 : index
    %64 = vector.load %arg7[%c0_34, %c0_35] : memref<4x1xf32, #tpu.memory_space<vmem>>, vector<4x1xf32>
    %65 = vector.broadcast %64 : vector<4x1xf32> to vector<4x512xf32>
    %66 = arith.addf %63, %65 : vector<4x512xf32>
    %67 = arith.addf %66, %0 : vector<4x512xf32>
    %c0_36 = arith.constant 0 : index
    %c0_37 = arith.constant 0 : index
    %68 = vector.load %arg8[%c0_36, %c0_37] : memref<4x512xf32, #tpu.memory_space<vmem>>, vector<4x512xf32>
    tpu.vector_store %arg8[%c0_36, %c0_37], %67 {strides = array<i32>} : memref<4x512xf32, #tpu.memory_space<vmem>>, vector<4x512xf32>,
    return
  }
  func.func @transform_0(%arg0: i32) -> (i32, i32) {
    %c0_i32 = arith.constant 0 : i32
    %c0_i32_0 = arith.constant 0 : i32
    return %c0_i32, %arg0 : i32, i32
  }
  func.func @transform_1(%arg0: i32) -> (i32, i32) {
    %c0_i32 = arith.constant 0 : i32
    %c0_i32_0 = arith.constant 0 : i32
    %c0_i32_1 = arith.constant 0 : i32
    return %c0_i32, %c0_i32_0 : i32, i32
  }
  func.func @transform_2(%arg0: i32) -> (i32, i32) {
    %c0_i32 = arith.constant 0 : i32
    %c0_i32_0 = arith.constant 0 : i32
    %c0_i32_1 = arith.constant 0 : i32
    return %c0_i32, %c0_i32_0 : i32, i32
  }
  func.func @transform_3(%arg0: i32) -> (i32, i32, i32) {
    %c0_i32 = arith.constant 0 : i32
    %c0_i32_0 = arith.constant 0 : i32
    %c0_i32_1 = arith.constant 0 : i32
    %c0_i32_2 = arith.constant 0 : i32
    return %c0_i32, %c0_i32_0, %c0_i32_1 : i32, i32, i32
  }
  func.func @transform_4(%arg0: i32) -> (i32, i32) {
    %c0_i32 = arith.constant 0 : i32
    %c0_i32_0 = arith.constant 0 : i32
    %c0_i32_1 = arith.constant 0 : i32
    return %c0_i32, %c0_i32_0 : i32, i32
  }
  func.func @transform_5(%arg0: i32) -> (i32, i32) {
    %c0_i32 = arith.constant 0 : i32
    %c0_i32_0 = arith.constant 0 : i32
    %c0_i32_1 = arith.constant 0 : i32
    return %c0_i32, %c0_i32_0 : i32, i32
  }
  func.func @transform_6(%arg0: i32) -> (i32, i32) {
    %c0_i32 = arith.constant 0 : i32
    %c0_i32_0 = arith.constant 0 : i32
    %c0_i32_1 = arith.constant 0 : i32
    return %c0_i32, %c0_i32_0 : i32, i32
  }
  func.func @transform_7(%arg0: i32) -> (i32, i32) {
    %c0_i32 = arith.constant 0 : i32
    %c0_i32_0 = arith.constant 0 : i32
    return %c0_i32, %arg0 : i32, i32
  }
}

</mosaic_0001>

<bundles_post_ra>
// kernel: squeeze.5
= control target key start
LH: loop header
LB: loop body
LE: loop exit
PB: predicated region body
PF: predicated region fallthrough
CT: control target
= control target key end

     0   :  { %vm16_vm0 = vcmask 97280   ;;  %s61_s0 = inlined_call_operand.vmem [shape: f32[12,3,3], index: 0, kind: input, shape index: {}]   ;;  %s62_s1 = inlined_call_operand.vmem [shape: f32[12,9], index: 1, kind: output, shape index: {}]  }
   0x1   :  { %v29_v0 = vld [vmem:[%s61_s0 + $0x8] sm:$0xf]  ;;  %v30_v1 = vld [vmem:[%s61_s0 + $0x4] sm:$0xf]  ;;  %v13_v2 = vld [vmem:[%s61_s0] sm:$0xf] }
   0x2   :  { %8 = vst [vmem:[#allocation0 + $0x10] sm:$0xf] %v29_v0  ;;  %12 = vst [vmem:[#allocation0 + $0x8] sm:$0xf] %v30_v1 }
   0x3   :  { %14 = vst [vmem:[#allocation0] sm:$0xf] %v13_v2 }
   0x9   :  { %v19_v4 = vld [vmem:[#allocation0 + $0x8] sm:$0x7]   ;;  %v24_v5 = vld [vmem:[#allocation0 + $0x10] sm:$0x7]  }
   0xa   :  { %v15_v3 = vld [vmem:[#allocation0] sm:$0x7]   ;;  %31 = vst.msk [vmem:[%s62_s1 + $0x3] sm:$0x7] %vm16_vm0, %v19_v4   ;;  %32 = vst.msk [vmem:[%s62_s1 + $0x6] sm:$0x7] %vm16_vm0, %v24_v5  }
   0xb   :  { %17 = vst.msk [vmem:[%s62_s1] sm:$0x7] %vm16_vm0, %v15_v3  }

// kernel: forward.1
= control target key start
LH: loop header
LB: loop body
LE: loop exit
PB: predicated region body
PF: predicated region fallthrough
CT: control target
= control target key end

     0   :  { %vm53_vm0 = vcmask 1043456   ;;  %v986_v2 = vmov 0.0   ;;  %v987_v5 = vmov 0   ;;  %vm46_vm1 = vcmask 31744   ;;  %s991_s17 = smov 1   ;;  %s992_s18 = smov 127   ;;  %s1775_s0 = inlined_call_operand.vmem [shape: f32[4,512], index: 0, kind: input, shape index: {}]   ;;  %s1776_s1 = inlined_call_operand.vmem [shape: f32[12,4], index: 1, kind: input, shape index: {}]   ;;  %s1777_s2 = inlined_call_operand.vmem [shape: f32[12,1], index: 2, kind: input, shape index: {}]   ;;  %s1778_s4 = inlined_call_operand.vmem [shape: f32[12,1], index: 4, kind: input, shape index: {}]   ;;  %s1779_s6 = inlined_call_operand.vmem [shape: f32[4,1], index: 6, kind: input, shape index: {}]   ;;  %s1780_s3 = inlined_call_operand.vmem [shape: f32[9,12,512], index: 3, kind: input, shape index: {}]   ;;  %s1781_s5 = inlined_call_operand.vmem [shape: f32[4,12], index: 5, kind: input, shape index: {}]   ;;  %s1782_s7 = inlined_call_operand.vmem [shape: f32[4,512], index: 7, kind: output, shape index: {}]  }
   0x1   :  { %v26_v0 = vld [vmem:[%s1775_s0] sm:$0xff]  ;;  %v27_v1 = vld [vmem:[%s1775_s0 + $0x8] sm:$0xff]  ;;  %126 = vmatprep.mubr.f32.mxu0 %v986_v2  ;;  %203 = vmatprep.mubr.f32.mxu1 %v986_v2  ;;  %s993_s19 = smov 113   ;;  %s994_s20 = smov 112   ;;  %vm996_vm10 = vmmov 1   ;;  %vm701_vm12 = vcmask 97280  }
   0x2   :  { %v1043_v3 = vcombine.high %v26_v0, %v26_v0  ;;  %v1045_v4 = vcombine.high %v27_v1, %v27_v1  ;;  %980 = vset.pattern.permute.xlu0 %v987_v5  ;;  %v30_v6 = vld [vmem:[%s1777_s2] sm:$0xff]  ;;  %981 = vset.pattern.permute.xlu1 %v987_v5  ;;  %v31_v8 = vld [vmem:[%s1777_s2 + $0x8] sm:$0xf]  ;;  %s989_s2 = smov 16   ;;  %s995_s21 = smov 111   ;;  %vm1746_vm11 = vmpackc.low %vm53_vm0, %vm996_vm10 }
   0x3   :  { %v28_v7 = vld [vmem:[%s1776_s1] sm:$0xff]  ;;  %34 = vperm.xlu0 %980, %v30_v6   ;;  %v659_v9 = vld [vmem:[%s1778_s4 + $0x8] sm:$0xf] }
   0x4   :  { %1791 = vst [vmem:[#allocation2_spill] sm:$0xff] %v1043_v3  ;;  %1792 = vst [vmem:[#allocation3_spill] sm:$0xff] %v1045_v4  ;;  %879 = vmatprep.subr.msk.mxu0 %vm53_vm0, %v1043_v3  ;;  %883 = vmatprep.subr.msk.mxu1 %vm53_vm0, %v1045_v4  ;;  %v29_v10 = vld [vmem:[%s1776_s1 + $0x8] sm:$0xf]  ;;  %v658_v11 = vld [vmem:[%s1778_s4] sm:$0xff]  ;;  %s988_s1 = smov 17  }
   0x5   :  { %880 = vmatpush1.msk.msra.mxu0 %vm53_vm0, %v26_v0  ;;  %884 = vmatpush1.msk.msra.mxu1 %vm53_vm0, %v27_v1  ;;  %s990_s4 = smov 15   ;;  %v695_v52 = vld [vmem:[%s1779_s6] sm:$0xf]  ;;  %v266_v3 = vld [vmem:[%s1780_s3 + $0x38] sm:$0xf] }
   0x6   :  { %881 = vmatmul.mubr.msk.f32.vlgmr.msra.gmra.mrb[0].mxu0 %vm46_vm1, %v28_v7  ;;  %885 = vmatmul.mubr.msk.f32.vlgmr.msra.gmra.mrb[0].mxu1 %vm46_vm1, %v28_v7 }
   0x7   :  { %132 = vmatprep.mubr.f32.mxu0 %v986_v2  ;;  %209 = vmatprep.mubr.f32.mxu1 %v986_v2 }
   0x8   :  { %39 = vperm.xlu0 %980, %v31_v8   ;;  %667 = vperm.xlu1 %981, %v659_v9  }
   0xa   :  { %882 = vmatmul.mubr.msk.f32.gmra.mrb[2].mxu0 %vm46_vm1, %v29_v10  ;;  %886 = vmatmul.mubr.msk.f32.gmra.mrb[2].mxu1 %vm46_vm1, %v29_v10 }
   0xb   :  { %781 = vmatprep.mubr.f32.mxu0 %v986_v2  ;;  %852 = vmatprep.mubr.f32.mxu1 %v986_v2 }
   0xc   :  { %662 = vperm.xlu0 %980, %v658_v11  }
  0x82   :  { %v35_v12 = vpop.permute.xlu0 %34 }
  0x87   :  { %v40_v20 = vpop.permute.xlu0 %39  ;;  %v1203_v46 = vpop.permute.xlu1 %667 }
  0x88   :  { %1793 = vst [vmem:[#allocation4_spill] sm:$0xff] %v1203_v46 }
  0x8b   :  { %v1205_v47 = vpop.permute.xlu0 %662 }
  0x8c   :  { %1794 = vst [vmem:[#allocation5_spill] sm:$0xff] %v1205_v47 }
  0xd9   :  { %v128_v13 = vpop.f32.mrb[0].mxu0  ;;  %v205_v14 = vpop.f32.mrb[0].mxu1 }
  0xda   :  { %v129_v15 = vadd.f32 %v128_v13, %v35_v12  ;;  %v206_v16 = vadd.f32 %v205_v14, %v35_v12  ;;  %v130_v17 = vpop.f32.mrb[1].mxu0  ;;  %v207_v18 = vpop.f32.mrb[1].mxu1 }
  0xdb   :  { %v208_v19 = vadd.f32 %v207_v18, %v35_v12  ;;  %v131_v35 = vadd.f32 %v130_v17, %v35_v12  ;;  %v248_v17 = vlaneseq }
  0xdc   :  { %v216_v21 = vmax.f32 %v129_v15, 0.0  ;;  %v218_v22 = vmax.f32 %v206_v16, 0.0 }
  0xdd   :  { %v134_v23 = vpop.f32.mrb[2].mxu0  ;;  %v211_v24 = vpop.f32.mrb[2].mxu1  ;;  %v217_v36 = vmax.f32 %v131_v35, 0.0  ;;  %v219_v38 = vmax.f32 %v208_v19, 0.0  ;;  %v1282_v18 = vand.u32 127, %v248_v17  ;;  %v262_v35 = vld [vmem:[%s1780_s3 + $0x18] sm:$0xff] }
  0xde   :  { %v1075_v25 = vmin.f32 %v216_v21, 6.0  ;;  %v1077_v26 = vmin.f32 %v218_v22, 6.0  ;;  %v135_v27 = vadd.f32 %v134_v23, %v40_v20  ;;  %v212_v28 = vadd.f32 %v211_v24, %v40_v20  ;;  %v136_v29 = vpop.f32.mrb[3].mxu0  ;;  %v213_v30 = vpop.f32.mrb[3].mxu1  ;;  %v261_v23 = vld [vmem:[%s1780_s3 + $0x10] sm:$0xff] }
  0xdf   :  { %v1143_v37 = vmin.f32 %v217_v36, 6.0  ;;  %v137_v39 = vadd.f32 %v136_v29, %v40_v20  ;;  %v1149_v40 = vmin.f32 %v219_v38, 6.0  ;;  %v214_v42 = vadd.f32 %v213_v30, %v40_v20  ;;  %v890_v38 = vld [vmem:[%s1780_s3 + $0x58] sm:$0xff] }
  0xe0   :  { %v220_v31 = vmax.f32 %v135_v27, 0.0  ;;  %240 = vrot.lane.b32.xlu0 %v1077_v26, %s988_s1  ;;  %232 = vrot.lane.b32.xlu1 %v1075_v25, %s988_s1  ;;  %v222_v33 = vmax.f32 %v212_v28, 0.0  ;;  %vm250_vm2 = vcmp.lt.s32.totalorder %v1282_v18, 17  ;;  %vm299_vm3 = vcmp.lt.s32.totalorder %v1282_v18, 16  ;;  %v889_v27 = vld [vmem:[%s1780_s3 + $0x50] sm:$0xff] }
  0xe1   :  { %v221_v41 = vmax.f32 %v137_v39, 0.0  ;;  %v223_v44 = vmax.f32 %v214_v42, 0.0  ;;  %vm349_vm4 = vcmp.lt.s32.totalorder %v1282_v18, 15  ;;  %vm399_vm5 = vcmp.lt.s32.totalorder %v1282_v18, 1 }
  0xe2   :  { %v1083_v32 = vmin.f32 %v220_v31, 6.0  ;;  %v1089_v34 = vmin.f32 %v222_v33, 6.0  ;;  %vm474_vm6 = vcmp.lt.s32.totalorder %v1282_v18, 127  ;;  %vm524_vm7 = vcmp.lt.s32.totalorder %v1282_v18, 113 }
  0xe3   :  { %v1155_v43 = vmin.f32 %v221_v41, 6.0  ;;  %v1161_v45 = vmin.f32 %v223_v44, 6.0  ;;  %vm574_vm8 = vcmp.lt.s32.totalorder %v1282_v18, 112  ;;  %vm624_vm9 = vcmp.lt.s32.totalorder %v1282_v18, 111 }
  0xe4   :  { %283 = vrot.lane.b32.xlu0 %v1075_v25, %s989_s2  ;;  %234 = vrot.lane.b32.xlu1 %v1083_v32, %s988_s1 }
  0xe8   :  { %291 = vrot.lane.b32.xlu0 %v1077_v26, %s989_s2  ;;  %242 = vrot.lane.b32.xlu1 %v1089_v34, %s988_s1 }
  0xec   :  { %333 = vrot.lane.b32.xlu0 %v1075_v25, %s990_s4  ;;  %285 = vrot.lane.b32.xlu1 %v1083_v32, %s989_s2 }
  0xf0   :  { %341 = vrot.lane.b32.xlu0 %v1077_v26, %s990_s4  ;;  %293 = vrot.lane.b32.xlu1 %v1089_v34, %s989_s2 }
  0xf4   :  { %383 = vrot.lane.b32.xlu0 %v1075_v25, %s991_s17  ;;  %335 = vrot.lane.b32.xlu1 %v1083_v32, %s990_s4 }
  0xf8   :  { %391 = vrot.lane.b32.xlu0 %v1077_v26, %s991_s17  ;;  %343 = vrot.lane.b32.xlu1 %v1089_v34, %s990_s4 }
  0xfc   :  { %458 = vrot.lane.b32.xlu0 %v1075_v25, %s992_s18  ;;  %385 = vrot.lane.b32.xlu1 %v1083_v32, %s991_s17 }
 0x100   :  { %466 = vrot.lane.b32.xlu0 %v1077_v26, %s992_s18  ;;  %393 = vrot.lane.b32.xlu1 %v1089_v34, %s991_s17 }
 0x104   :  { %508 = vrot.lane.b32.xlu0 %v1075_v25, %s993_s19  ;;  %460 = vrot.lane.b32.xlu1 %v1083_v32, %s992_s18 }
 0x108   :  { %516 = vrot.lane.b32.xlu0 %v1077_v26, %s993_s19  ;;  %468 = vrot.lane.b32.xlu1 %v1089_v34, %s992_s18 }
 0x10c   :  { %558 = vrot.lane.b32.xlu0 %v1075_v25, %s994_s20  ;;  %510 = vrot.lane.b32.xlu1 %v1083_v32, %s993_s19 }
 0x110   :  { %566 = vrot.lane.b32.xlu0 %v1077_v26, %s994_s20  ;;  %518 = vrot.lane.b32.xlu1 %v1089_v34, %s993_s19 }
 0x114   :  { %608 = vrot.lane.b32.xlu0 %v1075_v25, %s995_s21  ;;  %560 = vrot.lane.b32.xlu1 %v1083_v32, %s994_s20 }
 0x118   :  { %616 = vrot.lane.b32.xlu0 %v1077_v26, %s995_s21  ;;  %568 = vrot.lane.b32.xlu1 %v1089_v34, %s994_s20 }
 0x11c   :  { %236 = vrot.lane.b32.xlu0 %v1143_v37, %s988_s1  ;;  %610 = vrot.lane.b32.xlu1 %v1083_v32, %s995_s21 }
 0x120   :  { %244 = vrot.lane.b32.xlu0 %v1149_v40, %s988_s1  ;;  %618 = vrot.lane.b32.xlu1 %v1089_v34, %s995_s21 }
 0x124   :  { %287 = vrot.lane.b32.xlu0 %v1143_v37, %s989_s2  ;;  %238 = vrot.lane.b32.xlu1 %v1155_v43, %s988_s1 }
 0x128   :  { %295 = vrot.lane.b32.xlu0 %v1149_v40, %s989_s2  ;;  %246 = vrot.lane.b32.xlu1 %v1161_v45, %s988_s1 }
 0x12c   :  { %337 = vrot.lane.b32.xlu0 %v1143_v37, %s990_s4  ;;  %289 = vrot.lane.b32.xlu1 %v1155_v43, %s989_s2 }
 0x130   :  { %345 = vrot.lane.b32.xlu0 %v1149_v40, %s990_s4  ;;  %297 = vrot.lane.b32.xlu1 %v1161_v45, %s989_s2 }
 0x134   :  { %387 = vrot.lane.b32.xlu0 %v1143_v37, %s991_s17  ;;  %339 = vrot.lane.b32.xlu1 %v1155_v43, %s990_s4 }
 0x138   :  { %395 = vrot.lane.b32.xlu0 %v1149_v40, %s991_s17  ;;  %347 = vrot.lane.b32.xlu1 %v1161_v45, %s990_s4 }
 0x13c   :  { %462 = vrot.lane.b32.xlu0 %v1143_v37, %s992_s18  ;;  %389 = vrot.lane.b32.xlu1 %v1155_v43, %s991_s17 }
 0x140   :  { %470 = vrot.lane.b32.xlu0 %v1149_v40, %s992_s18  ;;  %397 = vrot.lane.b32.xlu1 %v1161_v45, %s991_s17 }
 0x144   :  { %512 = vrot.lane.b32.xlu0 %v1143_v37, %s993_s19  ;;  %464 = vrot.lane.b32.xlu1 %v1155_v43, %s992_s18 }
 0x148   :  { %520 = vrot.lane.b32.xlu0 %v1149_v40, %s993_s19  ;;  %472 = vrot.lane.b32.xlu1 %v1161_v45, %s992_s18 }
 0x14c   :  { %562 = vrot.lane.b32.xlu0 %v1143_v37, %s994_s20  ;;  %514 = vrot.lane.b32.xlu1 %v1155_v43, %s993_s19 }
 0x150   :  { %570 = vrot.lane.b32.xlu0 %v1149_v40, %s994_s20  ;;  %522 = vrot.lane.b32.xlu1 %v1161_v45, %s993_s19 }
 0x152   :  { %v241_v48 = vpop.permute.xlu0 %240  ;;  %v1211_v49 = vpop.permute.xlu1 %232 }
 0x154   :  { %612 = vrot.lane.b32.xlu0 %v1143_v37, %s995_s21  ;;  %564 = vrot.lane.b32.xlu1 %v1155_v43, %s994_s20 }
 0x156   :  { %v1217_v50 = vpop.permute.xlu0 %283  ;;  %v1219_v51 = vpop.permute.xlu1 %234 }
 0x158   :  { %620 = vrot.lane.b32.xlu0 %v1149_v40, %s995_s21  ;;  %572 = vrot.lane.b32.xlu1 %v1161_v45, %s994_s20 }
 0x15a   :  { %v292_v53 = vpop.permute.xlu0 %291  ;;  %v1228_v54 = vpop.permute.xlu1 %242 }
 0x15c   :  { %698 = vperm.xlu0 %980, %v695_v52   ;;  %614 = vrot.lane.b32.xlu1 %v1155_v43, %s995_s21 }
 0x15e   :  { %v1232_v55 = vpop.permute.xlu0 %333  ;;  %v1234_v56 = vpop.permute.xlu1 %285 }
 0x160   :  { %622 = vrot.lane.b32.xlu1 %v1161_v45, %s995_s21 }
 0x162   :  { %v1238_v57 = vpop.permute.xlu0 %341  ;;  %v1240_v58 = vpop.permute.xlu1 %293 }
 0x166   :  { %v1242_v59 = vpop.permute.xlu0 %383  ;;  %v1244_v60 = vpop.permute.xlu1 %335 }
 0x16a   :  { %v1246_v61 = vpop.permute.xlu0 %391  ;;  %v1248_v62 = vpop.permute.xlu1 %343 }
 0x16e   :  { %v1250_v63 = vpop.permute.xlu0 %458  ;;  %v1252_v0 = vpop.permute.xlu1 %385 }
 0x172   :  { %v1254_v1 = vpop.permute.xlu0 %466  ;;  %v1256_v2 = vpop.permute.xlu1 %393 }
 0x176   :  { %v1258_v5 = vpop.permute.xlu0 %508  ;;  %v1260_v6 = vpop.permute.xlu1 %460 }
 0x17a   :  { %v1262_v7 = vpop.permute.xlu0 %516  ;;  %v1264_v8 = vpop.permute.xlu1 %468 }
 0x17e   :  { %v1266_v9 = vpop.permute.xlu0 %558  ;;  %v1268_v10 = vpop.permute.xlu1 %510 }
 0x182   :  { %v1270_v11 = vpop.permute.xlu0 %566  ;;  %v1272_v12 = vpop.permute.xlu1 %518 }
 0x186   :  { %v1274_v13 = vpop.permute.xlu0 %608  ;;  %v1276_v14 = vpop.permute.xlu1 %560 }
 0x187   :  { %1795 = vst [vmem:[#allocation6_spill] sm:$0xff] %v1276_v14 }
 0x18a   :  { %v1278_v15 = vpop.permute.xlu0 %616  ;;  %v1280_v16 = vpop.permute.xlu1 %568 }
 0x18b   :  { %1796 = vst [vmem:[#allocation7_spill] sm:$0xff] %v1280_v16 }
 0x18e   :  { %v237_v19 = vpop.permute.xlu0 %236  ;;  %v1284_v20 = vpop.permute.xlu1 %610 }
 0x18f   :  { %1797 = vst [vmem:[#allocation8_spill] sm:$0xff] %v1284_v20  ;;  %v253_v24 = vsel %vm250_vm2, %v237_v19, %v241_v48  ;;  %v255_v4 = vsel %vm250_vm2, %v1211_v49, %v237_v19  ;;  %v260_v19 = vld [vmem:[%s1780_s3 + $0x8] sm:$0xff]  ;;  %v259_v20 = vld [vmem:[%s1780_s3] sm:$0xff] }
 0x190   :  { %v269_v31 = vmul.f32 %v261_v23, %v253_v24  ;;  %v265_v23 = vld [vmem:[%s1780_s3 + $0x30] sm:$0xf] }
 0x191   :  { %v897_v24 = vld [vmem:[%s1780_s3 + $0x90] sm:$0xff] }
 0x192   :  { %v245_v21 = vpop.permute.xlu0 %244  ;;  %v1287_v22 = vpop.permute.xlu1 %618 }
 0x193   :  { %1798 = vst [vmem:[#allocation9_spill] sm:$0xff] %v1287_v22  ;;  %v251_v36 = vsel %vm250_vm2, %v241_v48, %v245_v21 }
 0x194   :  { %v270_v52 = vmul.f32 %v262_v35, %v251_v36  ;;  %v888_v36 = vld [vmem:[%s1780_s3 + $0x48] sm:$0xff] }
 0x196   :  { %v288_v28 = vpop.permute.xlu0 %287  ;;  %v1298_v29 = vpop.permute.xlu1 %238 }
 0x197   :  { %v302_v30 = vsel %vm299_vm3, %v288_v28, %v292_v53  ;;  %v254_v48 = vsel %vm250_vm2, %v1298_v29, %v1228_v54 }
 0x198   :  { %v319_v33 = vmul.f32 %v889_v27, %v302_v30 }
 0x19a   :  { %v327_v39 = vadd.f32 %v319_v33, %v269_v31  ;;  %v296_v41 = vpop.permute.xlu0 %295  ;;  %v1310_v42 = vpop.permute.xlu1 %246 }
 0x19b   :  { %v300_v44 = vsel %vm299_vm3, %v292_v53, %v296_v41  ;;  %v893_v53 = vld [vmem:[%s1780_s3 + $0x70] sm:$0xf]  ;;  %v252_v46 = vsel %vm250_vm2, %v1228_v54, %v1310_v42  ;;  %v887_v54 = vld [vmem:[%s1780_s3 + $0x40] sm:$0xff] }
 0x19c   :  { %v320_v17 = vmul.f32 %v890_v38, %v300_v44  ;;  %v304_v38 = vsel %vm299_vm3, %v1217_v50, %v288_v28  ;;  %v273_v44 = vmul.f32 %v265_v23, %v254_v48  ;;  %v898_v28 = vld [vmem:[%s1780_s3 + $0x98] sm:$0xff]  ;;  %v257_v48 = vsel %vm250_vm2, %v245_v21, %v1211_v49  ;;  %v896_v49 = vld [vmem:[%s1780_s3 + $0x88] sm:$0xff] }
 0x19d   :  { %v894_v23 = vld [vmem:[%s1780_s3 + $0x78] sm:$0xf]  ;;  %v318_v22 = vmul.f32 %v888_v36, %v304_v38  ;;  %v895_v36 = vld [vmem:[%s1780_s3 + $0x80] sm:$0xff] }
 0x19e   :  { %v328_v27 = vadd.f32 %v320_v17, %v270_v52  ;;  %v338_v30 = vpop.permute.xlu0 %337  ;;  %v1328_v31 = vpop.permute.xlu1 %289 }
 0x19f   :  { %v352_v33 = vsel %vm349_vm4, %v338_v30, %v1238_v57  ;;  %v303_v35 = vsel %vm299_vm3, %v1328_v31, %v1240_v58  ;;  %v354_v21 = vsel %vm349_vm4, %v1232_v55, %v338_v30 }
 0x1a0   :  { %v369_v52 = vmul.f32 %v897_v24, %v352_v33  ;;  %v323_v17 = vmul.f32 %v893_v53, %v303_v35  ;;  %v306_v24 = vsel %vm299_vm3, %v296_v41, %v1217_v50  ;;  %v274_v41 = vmul.f32 %v266_v3, %v252_v46  ;;  %v905_v3 = vld [vmem:[%s1780_s3 + $0xd0] sm:$0xff] }
 0x1a1   :  { %v901_v46 = vld [vmem:[%s1780_s3 + $0xb0] sm:$0xf]  ;;  %v368_v14 = vmul.f32 %v896_v49, %v354_v21 }
 0x1a2   :  { %v377_v53 = vadd.f32 %v369_v52, %v327_v39  ;;  %v331_v33 = vadd.f32 %v323_v17, %v273_v44  ;;  %v346_v35 = vpop.permute.xlu0 %345  ;;  %v1372_v47 = vpop.permute.xlu1 %297  ;;  %v268_v52 = vmul.f32 %v260_v19, %v255_v4  ;;  %v317_v17 = vmul.f32 %v887_v54, %v306_v24  ;;  %v913_v4 = vld [vmem:[%s1780_s3 + $0x110] sm:$0xff] }
 0x1a3   :  { %v350_v50 = vsel %vm349_vm4, %v1238_v57, %v346_v35  ;;  %v301_v39 = vsel %vm299_vm3, %v1240_v58, %v1372_v47  ;;  %v356_v38 = vsel %vm349_vm4, %v346_v35, %v1232_v55  ;;  %v904_v57 = vld [vmem:[%s1780_s3 + $0xc8] sm:$0xff]  ;;  %v267_v58 = vmul.f32 %v259_v20, %v257_v48 }
 0x1a4   :  { %v370_v44 = vmul.f32 %v898_v28, %v350_v50  ;;  %v324_v30 = vmul.f32 %v894_v23, %v301_v39  ;;  %v367_v19 = vmul.f32 %v895_v36, %v356_v38  ;;  %v903_v50 = vld [vmem:[%s1780_s3 + $0xc0] sm:$0xff]  ;;  %v906_v39 = vld [vmem:[%s1780_s3 + $0xd8] sm:$0xff]  ;;  %v444_v36 = vmul.f32 %v913_v4, %v1077_v26 }
 0x1a5   :  { %v325_v21 = vadd.f32 %v317_v17, %v267_v58  ;;  %v911_v17 = vld [vmem:[%s1780_s3 + $0x100] sm:$0xff] }
 0x1a6   :  { %v378_v16 = vadd.f32 %v370_v44, %v328_v27  ;;  %v332_v55 = vadd.f32 %v324_v30, %v274_v41  ;;  %v388_v28 = vpop.permute.xlu0 %387  ;;  %v340_v23 = vpop.permute.xlu1 %339  ;;  %v326_v27 = vadd.f32 %v318_v22, %v268_v52  ;;  %v902_v41 = vld [vmem:[%s1780_s3 + $0xb8] sm:$0xf] }
 0x1a7   :  { %v402_v54 = vsel %vm399_vm5, %v388_v28, %v1246_v61  ;;  %v404_v24 = vsel %vm399_vm5, %v1242_v59, %v388_v28  ;;  %v353_v20 = vsel %vm349_vm4, %v340_v23, %v1248_v62 }
 0x1a8   :  { %v418_v48 = vmul.f32 %v904_v57, %v404_v24  ;;  %v419_v35 = vmul.f32 %v905_v3, %v402_v54  ;;  %v373_v49 = vmul.f32 %v901_v46, %v353_v20  ;;  %v376_v38 = vadd.f32 %v368_v14, %v326_v27  ;;  %v912_v57 = vld [vmem:[%s1780_s3 + $0x108] sm:$0xff] }
 0x1a9   :  { %v375_v3 = vadd.f32 %v367_v19, %v325_v21  ;;  %v443_v4 = vmul.f32 %v912_v57, %v1143_v37  ;;  %v920_v19 = vld [vmem:[%s1780_s3 + $0x148] sm:$0xff] }
 0x1aa   :  { %v427_v22 = vadd.f32 %v419_v35, %v377_v53  ;;  %v381_v44 = vadd.f32 %v373_v49, %v331_v33  ;;  %v396_v30 = vpop.permute.xlu0 %395  ;;  %v348_v52 = vpop.permute.xlu1 %347  ;;  %v426_v33 = vadd.f32 %v418_v48, %v376_v38  ;;  %v909_v48 = vld [vmem:[%s1780_s3 + $0xf0] sm:$0xf]  ;;  %v264_v35 = vld [vmem:[%s1780_s3 + $0x28] sm:$0xf]  ;;  %v256_v49 = vsel %vm250_vm2, %v1219_v51, %v1298_v29 }
 0x1ab   :  { %v400_v26 = vsel %vm399_vm5, %v1246_v61, %v396_v30  ;;  %v406_v14 = vsel %vm399_vm5, %v396_v30, %v1242_v59  ;;  %v351_v53 = vsel %vm349_vm4, %v1248_v62, %v348_v52  ;;  %v442_v61 = vmul.f32 %v911_v17, %v1075_v25  ;;  %v892_v59 = vld [vmem:[%s1780_s3 + $0x68] sm:$0xf]  ;;  %v910_v30 = vld [vmem:[%s1780_s3 + $0xf8] sm:$0xf] }
 0x1ac   :  { %v417_v46 = vmul.f32 %v903_v50, %v406_v14  ;;  %v420_v58 = vmul.f32 %v906_v39, %v400_v26  ;;  %v374_v28 = vmul.f32 %v902_v41, %v351_v53  ;;  %v452_v54 = vadd.f32 %v444_v36, %v427_v22  ;;  %v900_v29 = vld [vmem:[%s1780_s3 + $0xa8] sm:$0xf]  ;;  %v921_v22 = vld [vmem:[%s1780_s3 + $0x150] sm:$0xff] }
 0x1ad   :  { %v305_v62 = vsel %vm299_vm3, %v1234_v56, %v1328_v31  ;;  %v451_v50 = vadd.f32 %v443_v4, %v426_v33  ;;  %v355_v36 = vsel %vm349_vm4, %v1244_v60, %v340_v23  ;;  %v272_v17 = vmul.f32 %v264_v35, %v256_v49  ;;  %v908_v23 = vld [vmem:[%s1780_s3 + $0xe8] sm:$0xf] }
 0x1ae   :  { %v425_v24 = vadd.f32 %v417_v46, %v375_v3  ;;  %v1455_v20 = vadd.f32 %v420_v58, %v378_v16  ;;  %v382_v37 = vadd.f32 %v374_v28, %v332_v55  ;;  %v463_v27 = vpop.permute.xlu0 %462  ;;  %v390_v25 = vpop.permute.xlu1 %389  ;;  %v917_v55 = vld [vmem:[%s1780_s3 + $0x130] sm:$0xf]  ;;  %v322_v41 = vmul.f32 %v892_v59, %v305_v62  ;;  %v263_v62 = vld [vmem:[%s1780_s3 + $0x20] sm:$0xf] }
 0x1af   :  { %v477_v16 = vsel %vm474_vm6, %v463_v27, %v1254_v1  ;;  %v403_v31 = vsel %vm399_vm5, %v390_v25, %v1256_v2  ;;  %v448_v14 = vmul.f32 %v917_v55, %v1089_v34  ;;  %v405_v53 = vsel %vm399_vm5, %v1252_v0, %v390_v25  ;;  %v891_v34 = vld [vmem:[%s1780_s3 + $0x60] sm:$0xf] }
 0x1b0   :  { %v1476_v21 = vadd.f32 %v442_v61, %v425_v24  ;;  %v493_v39 = vmul.f32 %v920_v19, %v477_v16  ;;  %v423_v38 = vmul.f32 %v909_v48, %v403_v31  ;;  %v307_v28 = vsel %vm299_vm3, %v1372_v47, %v1234_v56  ;;  %v899_v47 = vld [vmem:[%s1780_s3 + $0xa0] sm:$0xf]  ;;  %v916_v16 = vld [vmem:[%s1780_s3 + $0x128] sm:$0xf] }
 0x1b1   :  { %v372_v4 = vmul.f32 %v900_v29, %v355_v36  ;;  %v330_v61 = vadd.f32 %v322_v41, %v272_v17  ;;  %v357_v56 = vsel %vm349_vm4, %v348_v52, %v1244_v60  ;;  %v422_v24 = vmul.f32 %v908_v23, %v405_v53  ;;  %v907_v60 = vld [vmem:[%s1780_s3 + $0xe0] sm:$0xf]  ;;  %v929_v41 = vld [vmem:[%s1780_s3 + $0x190] sm:$0xff] }
 0x1b2   :  { %v501_v57 = vadd.f32 %v493_v39, %v451_v50  ;;  %v1490_v3 = vpop.permute.xlu0 %470  ;;  %v398_v26 = vpop.permute.xlu1 %397  ;;  %v431_v33 = vadd.f32 %v423_v38, %v381_v44  ;;  %v321_v35 = vmul.f32 %v891_v34, %v307_v28  ;;  %v371_v55 = vmul.f32 %v899_v47, %v357_v56  ;;  %v924_v50 = vld [vmem:[%s1780_s3 + $0x168] sm:$0xf]  ;;  %v925_v29 = vld [vmem:[%s1780_s3 + $0x170] sm:$0xf] }
 0x1b3   :  { %v475_v46 = vsel %vm474_vm6, %v1254_v1, %v1490_v3  ;;  %v401_v58 = vsel %vm399_vm5, %v1256_v2, %v398_v26  ;;  %v258_v1 = vsel %vm250_vm2, %v1310_v42, %v1219_v51  ;;  %v928_v2 = vld [vmem:[%s1780_s3 + $0x188] sm:$0xff]  ;;  %v380_v31 = vadd.f32 %v372_v4, %v330_v61 }
 0x1b4   :  { %v494_v44 = vmul.f32 %v921_v22, %v475_v46  ;;  %v424_v19 = vmul.f32 %v910_v30, %v401_v58  ;;  %v456_v59 = vadd.f32 %v448_v14, %v431_v33  ;;  %v407_v52 = vsel %vm399_vm5, %v398_v26, %v1252_v0  ;;  %v919_v0 = vld [vmem:[%s1780_s3 + $0x140] sm:$0xff]  ;;  %v914_v22 = vld [vmem:[%s1780_s3 + $0x118] sm:$0xff] }
 0x1b5   :  { %v479_v36 = vsel %vm474_vm6, %v1250_v63, %v463_v27  ;;  %v430_v38 = vadd.f32 %v422_v24, %v380_v31  ;;  %v447_v17 = vmul.f32 %v916_v16, %v1155_v43  ;;  %v421_v53 = vmul.f32 %v907_v60, %v407_v52  ;;  %v915_v46 = vld [vmem:[%s1780_s3 + $0x120] sm:$0xf] }
 0x1b6   :  { %v502_v51 = vadd.f32 %v494_v44, %v452_v54  ;;  %v1530_v42 = vadd.f32 %v424_v19, %v382_v37  ;;  %v513_v48 = vpop.permute.xlu0 %512  ;;  %v465_v25 = vpop.permute.xlu1 %464  ;;  %v271_v37 = vmul.f32 %v263_v62, %v258_v1  ;;  %v492_v28 = vmul.f32 %v919_v0, %v479_v36  ;;  %v922_v44 = vld [vmem:[%s1780_s3 + $0x158] sm:$0xff]  ;;  %v923_v31 = vld [vmem:[%s1780_s3 + $0x160] sm:$0xf] }
 0x1b7   :  { %v527_v49 = vsel %vm524_vm7, %v513_v48, %v1262_v7  ;;  %v478_v39 = vsel %vm474_vm6, %v465_v25, %v1264_v8  ;;  %v445_v4 = vmul.f32 %v914_v22, %v1149_v40  ;;  %v481_v19 = vsel %vm474_vm6, %v1490_v3, %v1250_v63  ;;  %v918_v40 = vld [vmem:[%s1780_s3 + $0x138] sm:$0xf]  ;;  %v927_v3 = vld [vmem:[%s1780_s3 + $0x180] sm:$0xff] }
 0x1b8   :  { %v543_v54 = vmul.f32 %v928_v2, %v527_v49  ;;  %v329_v23 = vadd.f32 %v321_v35, %v271_v37  ;;  %v497_v58 = vmul.f32 %v924_v50, %v478_v39  ;;  %v455_v1 = vadd.f32 %v447_v17, %v430_v38 }
 0x1b9   :  { %v446_v24 = vmul.f32 %v915_v46, %v1083_v32  ;;  %v495_v32 = vmul.f32 %v922_v44, %v481_v19  ;;  %v480_v60 = vsel %vm474_vm6, %v1260_v6, %v465_v25  ;;  %v449_v52 = vmul.f32 %v918_v40, %v1161_v45  ;;  %v935_v45 = vld [vmem:[%s1780_s3 + $0x1c0] sm:$0xff] }
 0x1ba   :  { %v551_v30 = vadd.f32 %v543_v54, %v501_v57  ;;  %v521_v26 = vpop.permute.xlu0 %520  ;;  %v473_v14 = vpop.permute.xlu1 %472  ;;  %v379_v43 = vadd.f32 %v371_v55, %v329_v23  ;;  %v937_v54 = vld [vmem:[%s1780_s3 + $0x1d0] sm:$0xff]  ;;  %v500_v37 = vadd.f32 %v492_v28, %v1476_v21  ;;  %v453_v55 = vadd.f32 %v445_v4, %v1455_v20  ;;  %v930_v23 = vld [vmem:[%s1780_s3 + $0x198] sm:$0xff] }
 0x1bb   :  { %v525_v33 = vsel %vm524_vm7, %v1262_v7, %v521_v26  ;;  %v476_v27 = vsel %vm474_vm6, %v1264_v8, %v473_v14  ;;  %v936_v7 = vld [vmem:[%s1780_s3 + $0x1c8] sm:$0xff]  ;;  %v496_v38 = vmul.f32 %v923_v31, %v480_v60  ;;  %v934_v60 = vld [vmem:[%s1780_s3 + $0x1b8] sm:$0xf] }
 0x1bc   :  { %v544_v57 = vmul.f32 %v929_v41, %v525_v33  ;;  %v498_v34 = vmul.f32 %v925_v29, %v476_v27  ;;  %v932_v8 = vld [vmem:[%s1780_s3 + $0x1a8] sm:$0xf]  ;;  %v429_v56 = vadd.f32 %v421_v53, %v379_v43  ;;  %v503_v17 = vadd.f32 %v495_v32, %v453_v55  ;;  %v926_v27 = vld [vmem:[%s1780_s3 + $0x178] sm:$0xf]  ;;  %v941_v32 = vld [vmem:[%s1780_s3 + $0x1f0] sm:$0xf] }
 0x1bd   :  { %v531_v53 = vsel %vm524_vm7, %v521_v26, %v1258_v5  ;;  %v457_v33 = vadd.f32 %v449_v52, %v1530_v42  ;;  %v943_v42 = vld [vmem:[%s1780_s3 + $0x200] sm:$0xff]  ;;  %v938_v43 = vld [vmem:[%s1780_s3 + $0x1d8] sm:$0xff] }
 0x1be   :  { %v552_v61 = vadd.f32 %v544_v57, %v502_v51  ;;  %v506_v2 = vadd.f32 %v498_v34, %v456_v59  ;;  %v563_v62 = vpop.permute.xlu0 %562  ;;  %v515_v47 = vpop.permute.xlu1 %514  ;;  %v529_v59 = vsel %vm524_vm7, %v1258_v5, %v513_v48  ;;  %v505_v51 = vadd.f32 %v497_v58, %v455_v1  ;;  %v933_v48 = vld [vmem:[%s1780_s3 + $0x1b0] sm:$0xf]  ;;  %v931_v34 = vld [vmem:[%s1780_s3 + $0x1a0] sm:$0xf] }
 0x1bf   :  { %v577_v35 = vsel %vm574_vm8, %v563_v62, %v1270_v11  ;;  %v528_v63 = vsel %vm524_vm7, %v515_v47, %v1272_v12  ;;  %v542_v29 = vmul.f32 %v927_v3, %v529_v59  ;;  %v579_v0 = vsel %vm574_vm8, %v1266_v9, %v563_v62 }
 0x1c0   :  { %v593_v49 = vmul.f32 %v936_v7, %v577_v35  ;;  %v547_v16 = vmul.f32 %v932_v8, %v528_v63  ;;  %v454_v21 = vadd.f32 %v446_v24, %v429_v56  ;;  %v592_v46 = vmul.f32 %v935_v45, %v579_v0  ;;  %v1799_v8 = vld [vmem:[#allocation7_spill] sm:$0xff]  ;;  %v1800_v56 = vld [vmem:[#allocation6_spill] sm:$0xff]  ;;  %v945_v35 = vld [vmem:[%s1780_s3 + $0x210] sm:$0xff] }
 0x1c1   :  { %v530_v58 = vsel %vm524_vm7, %v1268_v10, %v515_v47  ;;  %v550_v19 = vadd.f32 %v542_v29, %v500_v37  ;;  %v946_v63 = vld [vmem:[%s1780_s3 + $0x218] sm:$0xff] }
 0x1c2   :  { %v601_v50 = vadd.f32 %v593_v49, %v551_v30  ;;  %v555_v39 = vadd.f32 %v547_v16, %v505_v51  ;;  %v571_v41 = vpop.permute.xlu0 %570  ;;  %v523_v25 = vpop.permute.xlu1 %522  ;;  %v504_v1 = vadd.f32 %v496_v38, %v454_v21  ;;  %v546_v59 = vmul.f32 %v931_v34, %v530_v58  ;;  %v947_v38 = vld [vmem:[%s1780_s3 + $0x220] sm:$0xf]  ;;  %v950_v34 = vld [vmem:[%s1780_s3 + $0x238] sm:$0xf] }
 0x1c3   :  { %v575_v36 = vsel %vm574_vm8, %v1270_v11, %v571_v41  ;;  %v526_v20 = vsel %vm524_vm7, %v1272_v12, %v523_v25  ;;  %v482_v11 = vsel %vm474_vm6, %v473_v14, %v1260_v6  ;;  %v940_v12 = vld [vmem:[%s1780_s3 + $0x1e8] sm:$0xf]  ;;  %v581_v28 = vsel %vm574_vm8, %v571_v41, %v1266_v9  ;;  %v939_v9 = vld [vmem:[%s1780_s3 + $0x1e0] sm:$0xf] }
 0x1c4   :  { %v594_v22 = vmul.f32 %v937_v54, %v575_v36  ;;  %v548_v30 = vmul.f32 %v933_v48, %v526_v20  ;;  %v944_v6 = vld [vmem:[%s1780_s3 + $0x208] sm:$0xff]  ;;  %v600_v3 = vadd.f32 %v592_v46, %v550_v19  ;;  %v595_v51 = vmul.f32 %v938_v43, %v581_v28 }
 0x1c5   :  { %v532_v52 = vsel %vm524_vm7, %v523_v25, %v1268_v10  ;;  %v942_v10 = vld [vmem:[%s1780_s3 + $0x1f8] sm:$0xf] }
 0x1c6   :  { %v602_v5 = vadd.f32 %v594_v22, %v552_v61  ;;  %v556_v26 = vadd.f32 %v548_v30, %v506_v2  ;;  %v613_v14 = vpop.permute.xlu0 %612  ;;  %v565_v57 = vpop.permute.xlu1 %564  ;;  %v545_v61 = vmul.f32 %v930_v23, %v531_v53  ;;  %v499_v2 = vmul.f32 %v926_v27, %v482_v11  ;;  %v1802_v53 = vld [vmem:[#allocation8_spill] sm:$0xff] }
 0x1c7   :  { %v627_v4 = vsel %vm624_vm9, %v613_v14, %v1278_v15  ;;  %v629_v7 = vsel %vm624_vm9, %v1274_v13, %v613_v14  ;;  %v578_v44 = vsel %vm574_vm8, %v565_v57, %v1799_v8  ;;  %v580_v24 = vsel %vm574_vm8, %v1800_v56, %v565_v57 }
 0x1c8   :  { %v597_v40 = vmul.f32 %v940_v12, %v578_v44  ;;  %v642_v62 = vmul.f32 %v943_v42, %v629_v7  ;;  %v643_v47 = vmul.f32 %v944_v6, %v627_v4  ;;  %v553_v55 = vadd.f32 %v545_v61, %v503_v17  ;;  %v1801_v17 = vld [vmem:[#allocation9_spill] sm:$0xff] }
 0x1c9   :  { %v549_v20 = vmul.f32 %v934_v60, %v532_v52  ;;  %v507_v12 = vadd.f32 %v499_v2, %v457_v33 }
 0x1ca   :  { %v605_v49 = vadd.f32 %v597_v40, %v555_v39  ;;  %v621_v16 = vpop.permute.xlu0 %620  ;;  %v573_v31 = vpop.permute.xlu1 %572  ;;  %v596_v39 = vmul.f32 %v939_v9, %v580_v24  ;;  %v650_v45 = vadd.f32 %v642_v62, %v600_v3  ;;  %v651_v0 = vadd.f32 %v643_v47, %v601_v50  ;;  %v948_v50 = vld [vmem:[%s1780_s3 + $0x228] sm:$0xf]  ;;  %v1804_v47 = vld [vmem:[#allocation4_spill] sm:$0xff] }
 0x1cb   :  { %v625_v54 = vsel %vm624_vm9, %v1278_v15, %v621_v16  ;;  %v631_v48 = vsel %vm624_vm9, %v621_v16, %v1274_v13  ;;  %v576_v37 = vsel %vm574_vm8, %v1799_v8, %v573_v31  ;;  %v582_v15 = vsel %vm574_vm8, %v573_v31, %v1800_v56 }
 0x1cc   :  { %v644_v41 = vmul.f32 %v945_v35, %v625_v54  ;;  %v645_v29 = vmul.f32 %v946_v63, %v631_v48  ;;  %v598_v25 = vmul.f32 %v941_v32, %v576_v37  ;;  %v554_v13 = vadd.f32 %v546_v59, %v504_v1 }
 0x1cd   :  { %v603_v36 = vadd.f32 %v595_v51, %v553_v55  ;;  %v599_v58 = vmul.f32 %v942_v10, %v582_v15  ;;  %v557_v43 = vadd.f32 %v549_v20, %v507_v12  ;;  %v694_v10 = vld [vmem:[%s1781_s5] sm:$0xf] }
 0x1ce   :  { %v652_v21 = vadd.f32 %v644_v41, %v602_v5  ;;  %v615_v22 = vpop.permute.xlu1 %614  ;;  %v606_v30 = vadd.f32 %v598_v25, %v556_v26  ;;  %v604_v27 = vadd.f32 %v596_v39, %v554_v13  ;;  %v1803_v5 = vld [vmem:[#allocation5_spill] sm:$0xff]  ;;  %v949_v26 = vld [vmem:[%s1780_s3 + $0x230] sm:$0xf] }
 0x1cf   :  { %v628_v23 = vsel %vm624_vm9, %v615_v22, %v1801_v17  ;;  %v630_v11 = vsel %vm624_vm9, %v1802_v53, %v615_v22  ;;  %v653_v46 = vadd.f32 %v645_v29, %v603_v36  ;;  %v670_v42 = vadd.f32 %v1803_v5, %v650_v45 }
 0x1d0   :  { %v671_v6 = vadd.f32 %v1803_v5, %v651_v0  ;;  %v646_v14 = vmul.f32 %v947_v38, %v630_v11  ;;  %v647_v57 = vmul.f32 %v948_v50, %v628_v23  ;;  %v672_v33 = vadd.f32 %v1803_v5, %v652_v21  ;;  %v984_v38 = vld [vmem:[%s1775_s0] sm:$0xff] }
 0x1d1   :  { %v673_v19 = vadd.f32 %v1803_v5, %v653_v46  ;;  %v607_v1 = vadd.f32 %v599_v58, %v557_v43  ;;  %v678_v2 = vmax.f32 %v670_v42, 0.0  ;;  %v1808_v58 = vld [vmem:[#allocation3_spill] sm:$0xff] }
 0x1d2   :  { %v623_v28 = vpop.permute.xlu1 %622  ;;  %v654_v4 = vadd.f32 %v646_v14, %v604_v27  ;;  %v655_v7 = vadd.f32 %v647_v57, %v605_v49  ;;  %v679_v62 = vmax.f32 %v671_v6, 0.0  ;;  %v680_v59 = vmax.f32 %v672_v33, 0.0  ;;  %v985_v27 = vld [vmem:[%s1775_s0 + $0x8] sm:$0xff] }
 0x1d3   :  { %v626_v8 = vsel %vm624_vm9, %v1801_v17, %v623_v28  ;;  %v632_v44 = vsel %vm624_vm9, %v623_v28, %v1802_v53  ;;  %v681_v51 = vmax.f32 %v673_v19, 0.0  ;;  %v686_v16 = vmin.f32 %v678_v2, 6.0 }
 0x1d4   :  { %v648_v61 = vmul.f32 %v949_v26, %v626_v8  ;;  %v649_v40 = vmul.f32 %v950_v34, %v632_v44  ;;  %v674_v9 = vadd.f32 %v1804_v47, %v654_v4  ;;  %v675_v56 = vadd.f32 %v1804_v47, %v655_v7 }
 0x1d5   :  { %v687_v32 = vmin.f32 %v679_v62, 6.0  ;;  %v688_v39 = vmin.f32 %v680_v59, 6.0  ;;  %v689_v41 = vmin.f32 %v681_v51, 6.0 }
 0x1d6   :  { %v656_v24 = vadd.f32 %v648_v61, %v606_v30  ;;  %v657_v35 = vadd.f32 %v649_v40, %v607_v1  ;;  %v682_v63 = vmax.f32 %v674_v9, 0.0  ;;  %v683_v3 = vmax.f32 %v675_v56, 0.0  ;;  %v1807_v30 = vld [vmem:[#allocation2_spill] sm:$0xff] }
 0x1d8   :  { %v676_v18 = vadd.f32 %v1804_v47, %v656_v24  ;;  %v677_v49 = vadd.f32 %v1804_v47, %v657_v35  ;;  %v690_v31 = vmin.f32 %v682_v63, 6.0  ;;  %v691_v60 = vmin.f32 %v683_v3, 6.0 }
 0x1da   :  { %v684_v52 = vmax.f32 %v676_v18, 0.0  ;;  %v685_v54 = vmax.f32 %v677_v49, 0.0  ;;  %v960_v37 = vpack.c.bf16 %v690_v31, %v686_v16  ;;  %v957_v55 = vpack.c.bf16 %v691_v60, %v687_v32 }
 0x1db   :  { %v699_v25 = vpop.permute.xlu0 %698 }
 0x1dc   :  { %v692_v29 = vmin.f32 %v684_v52, 6.0  ;;  %v693_v45 = vmin.f32 %v685_v54, 6.0  ;;  %959 = vmatprep.subr.msk.bf16.mxu0 %vm1746_vm11, %v957_v55 }
 0x1dd   :  { %962 = vmatpush1.bf16.msk.msra.mxu0 %vm1746_vm11, %v960_v37 }
 0x1de   :  { %v966_v0 = vpack.c.bf16 %v692_v29, %v688_v39  ;;  %v963_v15 = vpack.c.bf16 %v693_v45, %v689_v41 }
 0x1e0   :  { %965 = vmatprep.subr.msk.bf16.mxu1 %vm1746_vm11, %v963_v15  ;;  %953 = vmatmul.mubr.msk.f32.vlgmr.msra.gmra.mrb[4].mxu0 %vm701_vm12, %v694_v10 }
 0x1e1   :  { %968 = vmatpush1.bf16.msk.msra.mxu1 %vm1746_vm11, %v966_v0 }
 0x1e4   :  { %956 = vmatmul.mubr.msk.f32.vlgmr.msra.gmra.mrb[4].mxu1 %vm701_vm12, %v694_v10 }
 0x2b3   :  { %v783_v13 = vpop.f32.mrb[4].mxu0 }
 0x2b4   :  { %v784_v36 = vadd.f32 %v783_v13, %v699_v25  ;;  %v785_v20 = vpop.f32.mrb[5].mxu0 }
 0x2b5   :  { %v786_v21 = vadd.f32 %v785_v20, %v699_v25 }
 0x2b6   :  { %v861_v50 = vadd.f32 %v984_v38, %v784_v36 }
 0x2b7   :  { %v854_v22 = vpop.f32.mrb[4].mxu1  ;;  %v862_v17 = vadd.f32 %v786_v21, %v1807_v30 }
 0x2b8   :  { %v855_v23 = vadd.f32 %v854_v22, %v699_v25  ;;  %v856_v53 = vpop.f32.mrb[5].mxu1 }
 0x2b9   :  { %v857_v11 = vadd.f32 %v856_v53, %v699_v25  ;;  %v869_v12 = vcombine.low %v861_v50, %v862_v17 }
 0x2ba   :  { %v863_v46 = vadd.f32 %v985_v27, %v855_v23 }
 0x2bb   :  { %v864_v5 = vadd.f32 %v857_v11, %v1808_v58  ;;  %873 = vst [vmem:[%s1782_s7] sm:$0xff] %v869_v12 }
 0x2bd   :  { %v870_v42 = vcombine.low %v863_v46, %v864_v5 }
 0x2bf   :  { %874 = vst [vmem:[%s1782_s7 + $0x8] sm:$0xff] %v870_v42 }

</bundles_post_ra>
